<compile_context>
chip_gen: v5e
topology: v5e:2x2
jax: 0.10.0
libtpu: 0.0.40
codegen_flags: <defaults>
</compile_context>

<pallas_src>
import functools

import jax
import jax.numpy as jnp
from jax.experimental import pallas as pl
from jax.experimental.pallas import tpu as pltpu

HIDDEN = 13
IN_F = 1
OUT_F = 1

LANE = 1024                 # lane-dense slab width (multiple of 128)
SUBLANE = 8                 # f32 sublane granularity
MAX_BLOCK_ROWS = 1024       # 1024 x 1024 x 4 B = 4 MiB per tile buffer
TARGET_GRID_STEPS = 8       # aim for >= 8 grid steps (DMA overlap + v7x 2-TC balance)
VMEM_LIMIT_BYTES = 40 << 20  # > v5e's 16 MiB scoped default, < v7x's 64 MiB physical
SMALL_BATCH_THRESHOLD = 16384  # below this, plain fused XLA beats pallas_call overhead


def _round_up(v, m):
    return ((v + m - 1) // m) * m


def _cdiv(a, b):
    return (a + b - 1) // b


def _mlp_kernel(coef_ref, x_ref, o_ref, *, compute_dtype):
    # coef_ref: SMEM f32[3*HIDDEN + 1] = [w1(13) | b1(13) | w2(13) | b2(1)]
    # x_ref / o_ref: VMEM f32[(block_rows, LANE)] lane-dense batch tiles.
    x = x_ref[...].astype(compute_dtype)
    # Two partial accumulators (f32) break the 13-deep serial add chain so the
    # EUP tanh pushes and VPU mul/adds of adjacent terms interleave.
    acc0 = jnp.zeros(x_ref.shape, jnp.float32)
    acc1 = jnp.zeros(x_ref.shape, jnp.float32)
    # Statically unrolled 13-unit loop: 13 EUP tanh per vreg with VPU mul/adds
    # co-issued as filler in the same VLIW bundles; no XLU reduction, no MXU.
    for k in range(HIDDEN):
        w1_k = coef_ref[k].astype(compute_dtype)
        b1_k = coef_ref[HIDDEN + k].astype(compute_dtype)
        w2_k = coef_ref[2 * HIDDEN + k].astype(compute_dtype)
        term = (w2_k * jnp.tanh(x * w1_k + b1_k)).astype(jnp.float32)
        if k % 2 == 0:
            acc0 = acc0 + term
        else:
            acc1 = acc1 + term
    o_ref[...] = acc0 + acc1 + coef_ref[3 * HIDDEN]


def _pack_coef(w1, b1, w2, b2):
    return jnp.concatenate(
        [
            w1.reshape(HIDDEN).astype(jnp.float32),
            b1.reshape(HIDDEN).astype(jnp.float32),
            w2.reshape(HIDDEN).astype(jnp.float32),
            b2.reshape(OUT_F).astype(jnp.float32),
        ]
    )


def _run_rows(coef, x2d, compute_dtype):
    """Run the fused MLP over a lane-dense (rows, LANE) f32 slab."""
    rows = x2d.shape[0]
    if rows <= SUBLANE:
        # Full-array block (block dim == array dim satisfies the (8,128) rule).
        block_rows = rows
    else:
        block_rows = min(
            MAX_BLOCK_ROWS,
            max(SUBLANE, _round_up(_cdiv(rows, TARGET_GRID_STEPS), SUBLANE)),
        )
    grid = (_cdiv(rows, block_rows),)

    elems = rows * LANE
    cost = pl.CostEstimate(
        flops=52 * elems,            # 13 * (mul+add+mul+add) per element
        transcendentals=13 * elems,  # 13 tanh per element
        bytes_accessed=8 * elems,    # f32 in + f32 out
    )

    return pl.pallas_call(
        functools.partial(_mlp_kernel, compute_dtype=compute_dtype),
        out_shape=jax.ShapeDtypeStruct((rows, LANE), jnp.float32),
        grid=grid,
        in_specs=[
            # 40 scalars -> SMEM, whole array, no tiling / no VMEM pipeline.
            pl.BlockSpec(memory_space=pltpu.MemorySpace.SMEM),
            # Streaming lane-dense batch tiles (double-buffered by Pallas).
            pl.BlockSpec((block_rows, LANE), lambda i: (i, 0)),
        ],
        out_specs=pl.BlockSpec((block_rows, LANE), lambda i: (i, 0)),
        compiler_params=pltpu.CompilerParams(
            dimension_semantics=("parallel",),  # shards grid across v7x's 2 TCs
            vmem_limit_bytes=VMEM_LIMIT_BYTES,
        ),
        cost_estimate=cost,
    )(coef, x2d)


def _forward_pallas(x, w1, b1, w2, b2, *, bf16_inner=False):
    n = x.shape[0]
    compute_dtype = jnp.bfloat16 if bf16_inner else jnp.float32
    x_flat = x.reshape(-1).astype(jnp.float32)
    coef = _pack_coef(w1, b1, w2, b2)

    full_rows = n // LANE
    tail = n - full_rows * LANE

    if full_rows == 0:
        # Tiny forced-kernel batch: pad to a single (SUBLANE, LANE) tile (cheap).
        x_pad = jnp.zeros((SUBLANE * LANE,), jnp.float32).at[:n].set(x_flat)
        out = _run_rows(coef, x_pad.reshape(SUBLANE, LANE), compute_dtype)
        return out.reshape(-1)[:n].reshape(n, OUT_F)

    # Zero-copy main path: when tail == 0 the reshape is free (no pad/scatter,
    # no output slice).  The ragged final row-block (rows % block_rows != 0) is
    # handled inside the kernel by Pallas' masked boundary stores.
    x_main = x_flat if tail == 0 else x_flat[: full_rows * LANE]
    out_main = _run_rows(coef, x_main.reshape(full_rows, LANE), compute_dtype)
    out_main = out_main.reshape(full_rows * LANE, OUT_F)
    if tail == 0:
        return out_main

    # < LANE leftover elements: one fused XLA elementwise expression is cheaper
    # than padding the whole slab or launching an extra kernel step.
    x_tail = x_flat[full_rows * LANE:].reshape(tail, IN_F)
    out_tail = jnp.tanh(x_tail @ w1 + b1) @ w2 + b2
    return jnp.concatenate([out_main, out_tail.astype(jnp.float32)], axis=0)


def subclass_model_forward(x, w1, b1, w2, b2, *, force_kernel=False, bf16_inner=False):
    """x: (N, 1) f32.  w1: (1, 13), b1: (13,), w2: (13, 1), b2: (1,).

    Matches torch: y = Linear(13,1)(tanh(Linear(1,13)(x))); weights stored as
    (in_features, out_features), i.e. the transpose of torch's weight layout.
    """
    n = x.shape[0]
    if not force_kernel and n < SMALL_BATCH_THRESHOLD:
        # Tiny batches: plain fused XLA elementwise beats pallas_call overhead.
        return jnp.tanh(x @ w1 + b1) @ w2 + b2
    return _forward_pallas(x, w1, b1, w2, b2, bf16_inner=bf16_inner)


def init_params(key):
    """Deterministic init mirroring torch.nn.Linear default U(-1/sqrt(fan_in), 1/sqrt(fan_in))."""
    k1, k2, k3, k4 = jax.random.split(key, 4)
    bound1 = 1.0 / jnp.sqrt(float(IN_F))
    bound2 = 1.0 / jnp.sqrt(float(HIDDEN))
    w1 = jax.random.uniform(k1, (IN_F, HIDDEN), jnp.float32, -bound1, bound1)
    b1 = jax.random.uniform(k2, (HIDDEN,), jnp.float32, -bound1, bound1)
    w2 = jax.random.uniform(k3, (HIDDEN, OUT_F), jnp.float32, -bound2, bound2)
    b2 = jax.random.uniform(k4, (OUT_F,), jnp.float32, -bound2, bound2)
    return w1, b1, w2, b2


if __name__ == "__main__":
    key = jax.random.PRNGKey(0)
    k_x, k_p, k_x2 = jax.random.split(key, 3)
    w1, b1, w2, b2 = init_params(k_p)

    # 1) Small demo batch; force the Pallas path so the kernel runs once.
    N = 8
    x = jax.random.normal(k_x, (N, IN_F), jnp.float32)
    out = subclass_model_forward(x, w1, b1, w2, b2, force_kernel=True)
    out = jax.block_until_ready(out)
    ref = jnp.tanh(x @ w1 + b1) @ w2 + b2
    assert out.shape == (N, OUT_F)
    assert jnp.allclose(out, ref, atol=1e-5, rtol=1e-5)

    # 2) Exercise the streaming path: multi-row slab, multi-step grid with a
    #    ragged final row-block, plus a <LANE plain-JAX tail. Still tiny.
    N2 = 20 * LANE + 5
    x2 = jax.random.normal(k_x2, (N2, IN_F), jnp.float32)
    out2 = subclass_model_forward(x2, w1, b1, w2, b2, force_kernel=True)
    out2 = jax.block_until_ready(out2)
    ref2 = jnp.tanh(x2 @ w1 + b1) @ w2 + b2
    assert out2.shape == (N2, OUT_F)
    assert jnp.allclose(out2, ref2, atol=1e-5, rtol=1e-5)

    print("KERNEL_OK")
</pallas_src>

<mosaic_0001>
module attributes {stable_mosaic.version = 11 : i64} {
  func.func @_mlp_kernel(%arg0: i32, %arg1: memref<40xf32, #tpu.memory_space<smem>>, %arg2: memref<8x1024xf32, #tpu.memory_space<vmem>>, %arg3: memref<8x1024xf32, #tpu.memory_space<vmem>>) attributes {dimension_semantics = [#tpu.dimension_semantics<parallel>], iteration_bounds = array<i64: 1>, scalar_prefetch = 0 : i64, scratch_operands = 0 : i64, tpu.core_type = #tpu.core_type<tc>, window_params = [{transform_indices = @transform_0, window_bounds = array<i64: 40>}, {transform_indices = @transform_1, window_bounds = array<i64: 8, 1024>}, {transform_indices = @transform_2, window_bounds = array<i64: 8, 1024>}]} {
    %c0 = arith.constant 0 : index
    %c0_0 = arith.constant 0 : index
    %0 = vector.load %arg2[%c0, %c0_0] : memref<8x1024xf32, #tpu.memory_space<vmem>>, vector<8x1024xf32>
    %cst = arith.constant 0.000000e+00 : f32
    %1 = vector.broadcast %cst : f32 to vector<8x1024xf32>
    %cst_1 = arith.constant 0.000000e+00 : f32
    %2 = vector.broadcast %cst_1 : f32 to vector<8x1024xf32>
    %c0_2 = arith.constant 0 : index
    %3 = memref.load %arg1[%c0_2] : memref<40xf32, #tpu.memory_space<smem>>
    %c13 = arith.constant 13 : index
    %4 = memref.load %arg1[%c13] : memref<40xf32, #tpu.memory_space<smem>>
    %c26 = arith.constant 26 : index
    %5 = memref.load %arg1[%c26] : memref<40xf32, #tpu.memory_space<smem>>
    %6 = vector.broadcast %3 : f32 to vector<8x1024xf32>
    %7 = arith.mulf %0, %6 : vector<8x1024xf32>
    %8 = vector.broadcast %4 : f32 to vector<8x1024xf32>
    %9 = arith.addf %7, %8 : vector<8x1024xf32>
    %10 = math.tanh %9 : vector<8x1024xf32>
    %11 = vector.broadcast %5 : f32 to vector<8x1024xf32>
    %12 = arith.mulf %11, %10 : vector<8x1024xf32>
    %13 = arith.addf %1, %12 : vector<8x1024xf32>
    %c1 = arith.constant 1 : index
    %14 = memref.load %arg1[%c1] : memref<40xf32, #tpu.memory_space<smem>>
    %c14 = arith.constant 14 : index
    %15 = memref.load %arg1[%c14] : memref<40xf32, #tpu.memory_space<smem>>
    %c27 = arith.constant 27 : index
    %16 = memref.load %arg1[%c27] : memref<40xf32, #tpu.memory_space<smem>>
    %17 = vector.broadcast %14 : f32 to vector<8x1024xf32>
    %18 = arith.mulf %0, %17 : vector<8x1024xf32>
    %19 = vector.broadcast %15 : f32 to vector<8x1024xf32>
    %20 = arith.addf %18, %19 : vector<8x1024xf32>
    %21 = math.tanh %20 : vector<8x1024xf32>
    %22 = vector.broadcast %16 : f32 to vector<8x1024xf32>
    %23 = arith.mulf %22, %21 : vector<8x1024xf32>
    %24 = arith.addf %2, %23 : vector<8x1024xf32>
    %c2 = arith.constant 2 : index
    %25 = memref.load %arg1[%c2] : memref<40xf32, #tpu.memory_space<smem>>
    %c15 = arith.constant 15 : index
    %26 = memref.load %arg1[%c15] : memref<40xf32, #tpu.memory_space<smem>>
    %c28 = arith.constant 28 : index
    %27 = memref.load %arg1[%c28] : memref<40xf32, #tpu.memory_space<smem>>
    %28 = vector.broadcast %25 : f32 to vector<8x1024xf32>
    %29 = arith.mulf %0, %28 : vector<8x1024xf32>
    %30 = vector.broadcast %26 : f32 to vector<8x1024xf32>
    %31 = arith.addf %29, %30 : vector<8x1024xf32>
    %32 = math.tanh %31 : vector<8x1024xf32>
    %33 = vector.broadcast %27 : f32 to vector<8x1024xf32>
    %34 = arith.mulf %33, %32 : vector<8x1024xf32>
    %35 = arith.addf %13, %34 : vector<8x1024xf32>
    %c3 = arith.constant 3 : index
    %36 = memref.load %arg1[%c3] : memref<40xf32, #tpu.memory_space<smem>>
    %c16 = arith.constant 16 : index
    %37 = memref.load %arg1[%c16] : memref<40xf32, #tpu.memory_space<smem>>
    %c29 = arith.constant 29 : index
    %38 = memref.load %arg1[%c29] : memref<40xf32, #tpu.memory_space<smem>>
    %39 = vector.broadcast %36 : f32 to vector<8x1024xf32>
    %40 = arith.mulf %0, %39 : vector<8x1024xf32>
    %41 = vector.broadcast %37 : f32 to vector<8x1024xf32>
    %42 = arith.addf %40, %41 : vector<8x1024xf32>
    %43 = math.tanh %42 : vector<8x1024xf32>
    %44 = vector.broadcast %38 : f32 to vector<8x1024xf32>
    %45 = arith.mulf %44, %43 : vector<8x1024xf32>
    %46 = arith.addf %24, %45 : vector<8x1024xf32>
    %c4 = arith.constant 4 : index
    %47 = memref.load %arg1[%c4] : memref<40xf32, #tpu.memory_space<smem>>
    %c17 = arith.constant 17 : index
    %48 = memref.load %arg1[%c17] : memref<40xf32, #tpu.memory_space<smem>>
    %c30 = arith.constant 30 : index
    %49 = memref.load %arg1[%c30] : memref<40xf32, #tpu.memory_space<smem>>
    %50 = vector.broadcast %47 : f32 to vector<8x1024xf32>
    %51 = arith.mulf %0, %50 : vector<8x1024xf32>
    %52 = vector.broadcast %48 : f32 to vector<8x1024xf32>
    %53 = arith.addf %51, %52 : vector<8x1024xf32>
    %54 = math.tanh %53 : vector<8x1024xf32>
    %55 = vector.broadcast %49 : f32 to vector<8x1024xf32>
    %56 = arith.mulf %55, %54 : vector<8x1024xf32>
    %57 = arith.addf %35, %56 : vector<8x1024xf32>
    %c5 = arith.constant 5 : index
    %58 = memref.load %arg1[%c5] : memref<40xf32, #tpu.memory_space<smem>>
    %c18 = arith.constant 18 : index
    %59 = memref.load %arg1[%c18] : memref<40xf32, #tpu.memory_space<smem>>
    %c31 = arith.constant 31 : index
    %60 = memref.load %arg1[%c31] : memref<40xf32, #tpu.memory_space<smem>>
    %61 = vector.broadcast %58 : f32 to vector<8x1024xf32>
    %62 = arith.mulf %0, %61 : vector<8x1024xf32>
    %63 = vector.broadcast %59 : f32 to vector<8x1024xf32>
    %64 = arith.addf %62, %63 : vector<8x1024xf32>
    %65 = math.tanh %64 : vector<8x1024xf32>
    %66 = vector.broadcast %60 : f32 to vector<8x1024xf32>
    %67 = arith.mulf %66, %65 : vector<8x1024xf32>
    %68 = arith.addf %46, %67 : vector<8x1024xf32>
    %c6 = arith.constant 6 : index
    %69 = memref.load %arg1[%c6] : memref<40xf32, #tpu.memory_space<smem>>
    %c19 = arith.constant 19 : index
    %70 = memref.load %arg1[%c19] : memref<40xf32, #tpu.memory_space<smem>>
    %c32 = arith.constant 32 : index
    %71 = memref.load %arg1[%c32] : memref<40xf32, #tpu.memory_space<smem>>
    %72 = vector.broadcast %69 : f32 to vector<8x1024xf32>
    %73 = arith.mulf %0, %72 : vector<8x1024xf32>
    %74 = vector.broadcast %70 : f32 to vector<8x1024xf32>
    %75 = arith.addf %73, %74 : vector<8x1024xf32>
    %76 = math.tanh %75 : vector<8x1024xf32>
    %77 = vector.broadcast %71 : f32 to vector<8x1024xf32>
    %78 = arith.mulf %77, %76 : vector<8x1024xf32>
    %79 = arith.addf %57, %78 : vector<8x1024xf32>
    %c7 = arith.constant 7 : index
    %80 = memref.load %arg1[%c7] : memref<40xf32, #tpu.memory_space<smem>>
    %c20 = arith.constant 20 : index
    %81 = memref.load %arg1[%c20] : memref<40xf32, #tpu.memory_space<smem>>
    %c33 = arith.constant 33 : index
    %82 = memref.load %arg1[%c33] : memref<40xf32, #tpu.memory_space<smem>>
    %83 = vector.broadcast %80 : f32 to vector<8x1024xf32>
    %84 = arith.mulf %0, %83 : vector<8x1024xf32>
    %85 = vector.broadcast %81 : f32 to vector<8x1024xf32>
    %86 = arith.addf %84, %85 : vector<8x1024xf32>
    %87 = math.tanh %86 : vector<8x1024xf32>
    %88 = vector.broadcast %82 : f32 to vector<8x1024xf32>
    %89 = arith.mulf %88, %87 : vector<8x1024xf32>
    %90 = arith.addf %68, %89 : vector<8x1024xf32>
    %c8 = arith.constant 8 : index
    %91 = memref.load %arg1[%c8] : memref<40xf32, #tpu.memory_space<smem>>
    %c21 = arith.constant 21 : index
    %92 = memref.load %arg1[%c21] : memref<40xf32, #tpu.memory_space<smem>>
    %c34 = arith.constant 34 : index
    %93 = memref.load %arg1[%c34] : memref<40xf32, #tpu.memory_space<smem>>
    %94 = vector.broadcast %91 : f32 to vector<8x1024xf32>
    %95 = arith.mulf %0, %94 : vector<8x1024xf32>
    %96 = vector.broadcast %92 : f32 to vector<8x1024xf32>
    %97 = arith.addf %95, %96 : vector<8x1024xf32>
    %98 = math.tanh %97 : vector<8x1024xf32>
    %99 = vector.broadcast %93 : f32 to vector<8x1024xf32>
    %100 = arith.mulf %99, %98 : vector<8x1024xf32>
    %101 = arith.addf %79, %100 : vector<8x1024xf32>
    %c9 = arith.constant 9 : index
    %102 = memref.load %arg1[%c9] : memref<40xf32, #tpu.memory_space<smem>>
    %c22 = arith.constant 22 : index
    %103 = memref.load %arg1[%c22] : memref<40xf32, #tpu.memory_space<smem>>
    %c35 = arith.constant 35 : index
    %104 = memref.load %arg1[%c35] : memref<40xf32, #tpu.memory_space<smem>>
    %105 = vector.broadcast %102 : f32 to vector<8x1024xf32>
    %106 = arith.mulf %0, %105 : vector<8x1024xf32>
    %107 = vector.broadcast %103 : f32 to vector<8x1024xf32>
    %108 = arith.addf %106, %107 : vector<8x1024xf32>
    %109 = math.tanh %108 : vector<8x1024xf32>
    %110 = vector.broadcast %104 : f32 to vector<8x1024xf32>
    %111 = arith.mulf %110, %109 : vector<8x1024xf32>
    %112 = arith.addf %90, %111 : vector<8x1024xf32>
    %c10 = arith.constant 10 : index
    %113 = memref.load %arg1[%c10] : memref<40xf32, #tpu.memory_space<smem>>
    %c23 = arith.constant 23 : index
    %114 = memref.load %arg1[%c23] : memref<40xf32, #tpu.memory_space<smem>>
    %c36 = arith.constant 36 : index
    %115 = memref.load %arg1[%c36] : memref<40xf32, #tpu.memory_space<smem>>
    %116 = vector.broadcast %113 : f32 to vector<8x1024xf32>
    %117 = arith.mulf %0, %116 : vector<8x1024xf32>
    %118 = vector.broadcast %114 : f32 to vector<8x1024xf32>
    %119 = arith.addf %117, %118 : vector<8x1024xf32>
    %120 = math.tanh %119 : vector<8x1024xf32>
    %121 = vector.broadcast %115 : f32 to vector<8x1024xf32>
    %122 = arith.mulf %121, %120 : vector<8x1024xf32>
    %123 = arith.addf %101, %122 : vector<8x1024xf32>
    %c11 = arith.constant 11 : index
    %124 = memref.load %arg1[%c11] : memref<40xf32, #tpu.memory_space<smem>>
    %c24 = arith.constant 24 : index
    %125 = memref.load %arg1[%c24] : memref<40xf32, #tpu.memory_space<smem>>
    %c37 = arith.constant 37 : index
    %126 = memref.load %arg1[%c37] : memref<40xf32, #tpu.memory_space<smem>>
    %127 = vector.broadcast %124 : f32 to vector<8x1024xf32>
    %128 = arith.mulf %0, %127 : vector<8x1024xf32>
    %129 = vector.broadcast %125 : f32 to vector<8x1024xf32>
    %130 = arith.addf %128, %129 : vector<8x1024xf32>
    %131 = math.tanh %130 : vector<8x1024xf32>
    %132 = vector.broadcast %126 : f32 to vector<8x1024xf32>
    %133 = arith.mulf %132, %131 : vector<8x1024xf32>
    %134 = arith.addf %112, %133 : vector<8x1024xf32>
    %c12 = arith.constant 12 : index
    %135 = memref.load %arg1[%c12] : memref<40xf32, #tpu.memory_space<smem>>
    %c25 = arith.constant 25 : index
    %136 = memref.load %arg1[%c25] : memref<40xf32, #tpu.memory_space<smem>>
    %c38 = arith.constant 38 : index
    %137 = memref.load %arg1[%c38] : memref<40xf32, #tpu.memory_space<smem>>
    %138 = vector.broadcast %135 : f32 to vector<8x1024xf32>
    %139 = arith.mulf %0, %138 : vector<8x1024xf32>
    %140 = vector.broadcast %136 : f32 to vector<8x1024xf32>
    %141 = arith.addf %139, %140 : vector<8x1024xf32>
    %142 = math.tanh %141 : vector<8x1024xf32>
    %143 = vector.broadcast %137 : f32 to vector<8x1024xf32>
    %144 = arith.mulf %143, %142 : vector<8x1024xf32>
    %145 = arith.addf %123, %144 : vector<8x1024xf32>
    %146 = arith.addf %145, %134 : vector<8x1024xf32>
    %c39 = arith.constant 39 : index
    %147 = memref.load %arg1[%c39] : memref<40xf32, #tpu.memory_space<smem>>
    %148 = vector.broadcast %147 : f32 to vector<8x1024xf32>
    %149 = arith.addf %146, %148 : vector<8x1024xf32>
    %c0_3 = arith.constant 0 : index
    %c0_4 = arith.constant 0 : index
    %150 = vector.load %arg3[%c0_3, %c0_4] : memref<8x1024xf32, #tpu.memory_space<vmem>>, vector<8x1024xf32>
    tpu.vector_store %arg3[%c0_3, %c0_4], %149 {strides = array<i32>} : memref<8x1024xf32, #tpu.memory_space<vmem>>, vector<8x1024xf32>,
    return
  }
  func.func @transform_0(%arg0: i32) -> i32 {
    %c0_i32 = arith.constant 0 : i32
    %c0_i32_0 = arith.constant 0 : i32
    return %c0_i32 : i32
  }
  func.func @transform_1(%arg0: i32) -> (i32, i32) {
    %c0_i32 = arith.constant 0 : i32
    %c0_i32_0 = arith.constant 0 : i32
    return %arg0, %c0_i32 : i32, i32
  }
  func.func @transform_2(%arg0: i32) -> (i32, i32) {
    %c0_i32 = arith.constant 0 : i32
    %c0_i32_0 = arith.constant 0 : i32
    return %arg0, %c0_i32 : i32, i32
  }
}

</mosaic_0001>

<bundles_post_ra>
// kernel: tpu_custom_call.1
= control target key start
LH: loop header
LB: loop body
LE: loop exit
PB: predicated region body
PF: predicated region fallthrough
CT: control target
= control target key end

     0   :  { %7 = vsyncpa [#allocation5], 0  ;;  %s1595_s0 = inlined_call_operand.hbm [shape: f32[40], index: 0, kind: input, shape index: {}]   ;;  %s1596_s1 = inlined_call_operand.hbm [shape: f32[8,1024], index: 1, kind: input, shape index: {}]   ;;  %s1597_s2 = inlined_call_operand.hbm [shape: f32[8,1024], index: 2, kind: output, shape index: {}]  }
   0x1   :  { %8 = vsyncpa [#allocation3], 0 }
   0x2   :  { %9 = vsyncpa [#allocation4], 0  ;;  %s15_s11 = sshll.u32 %s1595_s0, 4  ;;  %s24_s14 = sshll.u32 %s1596_s1, 4  ;;  %s16_s11 = int_to_ptr.hbm [resolvable:$true] %s15_s11  ;;  %s25_s14 = int_to_ptr.hbm [resolvable:$true] %s24_s14 }
   0x3   :  { %s1013_s15 = smov [#allocation2]   ;;  %s1014_s16 = smov [#allocation6]  }
   0x4   :  { %18 = dma.hbm_to_smem %s16_s11, 16, %s1013_s15, [#allocation5]  }
   0x5   :  { %s26_s17 = sshll.u32 %s1014_s16, 4  ;;  %s27_s17 = int_to_ptr.vmem [resolvable:$true] %s26_s17 }
   0x6   :  { %29 = dma.hbm_to_vmem [thread:$0]  %s25_s14, 1024, %s27_s17, [#allocation3]  }
   0x7   :  { %1007 = dma.done.wait [#allocation5], 16  }
   0x8   :  { %1008 = vsyncadd [#allocation5], 4294967280 }
   0x9   :  { %1009 = dma.done.wait [#allocation3], 1024  }
   0xa   :  { %1010 = vsyncadd [#allocation3], 4294966272 }
   0xb   :  { %38 = sfence }
   0xc   :  { %s47_s18 = sld [smem:[#allocation2]]  ;;  %v1037_v0 = vld [vmem:[#allocation6] sm:$0xff]  ;;  %v1039_v1 = vld [vmem:[#allocation6 + $0x8] sm:$0xff]  ;;  %v1041_v2 = vld [vmem:[#allocation6 + $0x10] sm:$0xff] }
   0xd   :  { %s689_s19 = sld [smem:[#allocation2 + $0xd]]  ;;  %v1043_v4 = vld [vmem:[#allocation6 + $0x18] sm:$0xff]  ;;  %v1046_v6 = vld [vmem:[#allocation6 + $0x20] sm:$0xff]  ;;  %v1049_v8 = vld [vmem:[#allocation6 + $0x28] sm:$0xff] }
   0xe   :  { %s691_s0 = sld [smem:[#allocation2 + $0x1]]  ;;  %v1052_v11 = vld [vmem:[#allocation6 + $0x30] sm:$0xff]  ;;  %v1055_v13 = vld [vmem:[#allocation6 + $0x38] sm:$0xff] }
   0xf   :  { %s692_s1 = sld [smem:[#allocation2 + $0xe]] }
  0x10   :  { %s694_s20 = sld [smem:[#allocation2 + $0x2]] }
  0x11   :  { %s1063_s21 = sld [smem:[#allocation2 + $0xf]] }
  0x12   :  { %v50_v3 = vstv %s47_s18  ;;  %s1065_s22 = sld [smem:[#allocation2 + $0x1a]] }
  0x13   :  { %v51_v5 = vmul.f32 %v50_v3, %v1037_v0  ;;  %v52_v7 = vmul.f32 %v50_v3, %v1039_v1  ;;  %v53_v9 = vmul.f32 %v50_v3, %v1041_v2  ;;  %v59_v10 = vstv %s689_s19  ;;  %s1068_s23 = sld [smem:[#allocation2 + $0x1b]] }
  0x14   :  { %v54_v12 = vmul.f32 %v50_v3, %v1043_v4  ;;  %v55_v14 = vmul.f32 %v50_v3, %v1046_v6  ;;  %v56_v16 = vmul.f32 %v50_v3, %v1049_v8  ;;  %v96_v18 = vstv %s691_s0  ;;  %s1072_s24 = sld [smem:[#allocation2 + $0x1c]] }
  0x15   :  { %v60_v15 = vadd.f32 %v59_v10, %v51_v5  ;;  %v61_v17 = vadd.f32 %v59_v10, %v52_v7  ;;  %v57_v19 = vmul.f32 %v50_v3, %v1052_v11  ;;  %v62_v20 = vadd.f32 %v59_v10, %v53_v9  ;;  %s1076_s25 = sld [smem:[#allocation2 + $0x3]] }
  0x16   :  { %v58_v21 = vmul.f32 %v50_v3, %v1055_v13  ;;  %v63_v22 = vadd.f32 %v59_v10, %v54_v12  ;;  %v64_v23 = vadd.f32 %v59_v10, %v55_v14  ;;  %v97_v24 = vmul.f32 %v96_v18, %v1037_v0  ;;  %s1084_s26 = sld [smem:[#allocation2 + $0x10]] }
  0x17   :  { %731 = vtanh.f32 %v60_v15  ;;  %v65_v25 = vadd.f32 %v59_v10, %v56_v16  ;;  %v98_v26 = vmul.f32 %v96_v18, %v1039_v1  ;;  %v105_v27 = vstv %s692_s1  ;;  %s1111_s27 = sld [smem:[#allocation2 + $0x4]] }
  0x18   :  { %733 = vtanh.f32 %v61_v17  ;;  %v66_v28 = vadd.f32 %v59_v10, %v57_v19  ;;  %v99_v29 = vmul.f32 %v96_v18, %v1041_v2  ;;  %v67_v30 = vadd.f32 %v59_v10, %v58_v21  ;;  %s1124_s28 = sld [smem:[#allocation2 + $0x1d]] }
  0x19   :  { %735 = vtanh.f32 %v62_v20  ;;  %v100_v31 = vmul.f32 %v96_v18, %v1043_v4  ;;  %v101_v32 = vmul.f32 %v96_v18, %v1046_v6  ;;  %v106_v33 = vadd.f32 %v105_v27, %v97_v24  ;;  %s1133_s29 = sld [smem:[#allocation2 + $0x11]] }
  0x1a   :  { %737 = vtanh.f32 %v63_v22  ;;  %v102_v34 = vmul.f32 %v96_v18, %v1049_v8  ;;  %v107_v35 = vadd.f32 %v105_v27, %v98_v26  ;;  %v142_v36 = vstv %s694_s20  ;;  %s1158_s30 = sld [smem:[#allocation2 + $0x5]] }
  0x1b   :  { %739 = vtanh.f32 %v64_v23  ;;  %v103_v38 = vmul.f32 %v96_v18, %v1052_v11  ;;  %v108_v39 = vadd.f32 %v105_v27, %v99_v29  ;;  %v104_v41 = vmul.f32 %v96_v18, %v1055_v13  ;;  %s1184_s3 = sld [smem:[#allocation2 + $0x12]] }
  0x1c   :  { %741 = vtanh.f32 %v65_v25  ;;  %v109_v42 = vadd.f32 %v105_v27, %v100_v31  ;;  %v110_v44 = vadd.f32 %v105_v27, %v101_v32  ;;  %v143_v45 = vmul.f32 %v142_v36, %v1037_v0  ;;  %s1199_s4 = sld [smem:[#allocation2 + $0x1e]] }
  0x1d   :  { %v732_v37 = vpop.eup %731  ;;  %743 = vtanh.f32 %v66_v28  ;;  %v111_v47 = vadd.f32 %v105_v27, %v102_v34  ;;  %v144_v48 = vmul.f32 %v142_v36, %v1039_v1  ;;  %v151_v49 = vstv %s1063_s21  ;;  %s1217_s5 = sld [smem:[#allocation2 + $0x6]] }
  0x1e   :  { %v734_v40 = vpop.eup %733  ;;  %745 = vtanh.f32 %v67_v30  ;;  %v76_v51 = vstv %s1065_s22  ;;  %v112_v52 = vadd.f32 %v105_v27, %v103_v38  ;;  %v145_v53 = vmul.f32 %v142_v36, %v1041_v2  ;;  %s1228_s6 = sld [smem:[#allocation2 + $0x1f]] }
  0x1f   :  { %v736_v43 = vpop.eup %735  ;;  %747 = vtanh.f32 %v106_v33  ;;  %v113_v55 = vadd.f32 %v105_v27, %v104_v41  ;;  %v1087_v56 = vstv %s1068_s23  ;;  %v146_v57 = vmul.f32 %v142_v36, %v1043_v4  ;;  %s1237_s7 = sld [smem:[#allocation2 + $0x13]] }
  0x20   :  { %v738_v46 = vpop.eup %737  ;;  %749 = vtanh.f32 %v107_v35  ;;  %v147_v59 = vmul.f32 %v142_v36, %v1046_v6  ;;  %v152_v60 = vadd.f32 %v151_v49, %v143_v45  ;;  %v1092_v61 = vstv %s1072_s24  ;;  %s1260_s8 = sld [smem:[#allocation2 + $0x20]] }
  0x21   :  { %v740_v50 = vpop.eup %739  ;;  %751 = vtanh.f32 %v108_v39  ;;  %v1094_v63 = vmul.f32 %v732_v37, %v76_v51  ;;  %v148_v3 = vmul.f32 %v142_v36, %v1049_v8  ;;  %v153_v5 = vadd.f32 %v151_v49, %v144_v48  ;;  %s1268_s9 = sld [smem:[#allocation2 + $0x7]] }
  0x22   :  { %v742_v54 = vpop.eup %741  ;;  %753 = vtanh.f32 %v109_v42  ;;  %v149_v9 = vmul.f32 %v142_v36, %v1052_v11  ;;  %v154_v10 = vadd.f32 %v151_v49, %v145_v53  ;;  %v188_v12 = vstv %s1076_s25  ;;  %s1280_s10 = sld [smem:[#allocation2 + $0x14]] }
  0x23   :  { %v744_v58 = vpop.eup %743  ;;  %755 = vtanh.f32 %v110_v44  ;;  %v1099_v15 = vmul.f32 %v734_v40, %v76_v51  ;;  %v150_v16 = vmul.f32 %v142_v36, %v1055_v13  ;;  %v155_v17 = vadd.f32 %v151_v49, %v146_v57  ;;  %s1311_s11 = sld [smem:[#allocation2 + $0x8]] }
  0x24   :  { %v746_v62 = vpop.eup %745  ;;  %757 = vtanh.f32 %v111_v47  ;;  %v1102_v19 = vmul.f32 %v736_v43, %v76_v51  ;;  %v1104_v20 = vmul.f32 %v738_v46, %v76_v51  ;;  %v156_v21 = vadd.f32 %v151_v49, %v147_v59  ;;  %s1316_s12 = sld [smem:[#allocation2 + $0x21]] }
  0x25   :  { %v748_v7 = vpop.eup %747  ;;  %759 = vtanh.f32 %v112_v52  ;;  %v1106_v23 = vmul.f32 %v740_v50, %v76_v51  ;;  %v157_v24 = vadd.f32 %v151_v49, %v148_v3  ;;  %v189_v25 = vmul.f32 %v188_v12, %v1037_v0  ;;  %s1331_s13 = sld [smem:[#allocation2 + $0x15]] }
  0x26   :  { %v750_v14 = vpop.eup %749  ;;  %761 = vtanh.f32 %v113_v55  ;;  %v158_v27 = vadd.f32 %v151_v49, %v149_v9  ;;  %v190_v28 = vmul.f32 %v188_v12, %v1039_v1  ;;  %v197_v29 = vstv %s1084_s26  ;;  %s1352_s14 = sld [smem:[#allocation2 + $0x9]]  ;;  %s1015_s26 = smov [#allocation7]  }
  0x27   :  { %v752_v18 = vpop.eup %751  ;;  %763 = vtanh.f32 %v152_v60  ;;  %v1113_v31 = vmul.f32 %v742_v54, %v76_v51  ;;  %v159_v32 = vadd.f32 %v151_v49, %v150_v16  ;;  %v191_v33 = vmul.f32 %v188_v12, %v1041_v2  ;;  %s1376_s15 = sld [smem:[#allocation2 + $0x16]] }
  0x28   :  { %v754_v22 = vpop.eup %753  ;;  %765 = vtanh.f32 %v153_v5  ;;  %v1116_v35 = vmul.f32 %v744_v58, %v76_v51  ;;  %v1118_v36 = vmul.f32 %v746_v62, %v76_v51  ;;  %v192_v37 = vmul.f32 %v188_v12, %v1043_v4  ;;  %s1397_s16 = sld [smem:[#allocation2 + $0x22]] }
  0x29   :  { %v756_v26 = vpop.eup %755  ;;  %767 = vtanh.f32 %v154_v10  ;;  %v1122_v39 = vmul.f32 %v748_v7, %v1087_v56  ;;  %v193_v40 = vmul.f32 %v188_v12, %v1046_v6  ;;  %v198_v41 = vadd.f32 %v197_v29, %v189_v25  ;;  %s1414_s17 = sld [smem:[#allocation2 + $0xa]] }
  0x2a   :  { %v758_v30 = vpop.eup %757  ;;  %769 = vtanh.f32 %v155_v17  ;;  %v1128_v43 = vmul.f32 %v750_v14, %v1087_v56  ;;  %v1131_v44 = vmul.f32 %v752_v18, %v1087_v56  ;;  %v199_v45 = vadd.f32 %v197_v29, %v190_v28  ;;  %s1420_s18 = sld [smem:[#allocation2 + $0x23]] }
  0x2b   :  { %v760_v34 = vpop.eup %759  ;;  %771 = vtanh.f32 %v156_v21  ;;  %v1136_v47 = vmul.f32 %v754_v22, %v1087_v56  ;;  %v194_v48 = vmul.f32 %v188_v12, %v1049_v8  ;;  %v200_v49 = vadd.f32 %v197_v29, %v191_v33  ;;  %s1436_s19 = sld [smem:[#allocation2 + $0x17]] }
  0x2c   :  { %v762_v38 = vpop.eup %761  ;;  %773 = vtanh.f32 %v157_v24  ;;  %v1140_v51 = vmul.f32 %v756_v26, %v1087_v56  ;;  %v195_v52 = vmul.f32 %v188_v12, %v1052_v11  ;;  %v196_v53 = vmul.f32 %v188_v12, %v1055_v13  ;;  %s1447_s0 = sld [smem:[#allocation2 + $0x24]] }
  0x2d   :  { %v764_v42 = vpop.eup %763  ;;  %775 = vtanh.f32 %v158_v27  ;;  %v201_v54 = vadd.f32 %v197_v29, %v192_v37  ;;  %v1145_v57 = vmul.f32 %v758_v30, %v1087_v56  ;;  %v1148_v58 = vmul.f32 %v760_v34, %v1087_v56  ;;  %s1453_s1 = sld [smem:[#allocation2 + $0xb]] }
  0x2e   :  { %v766_v46 = vpop.eup %765  ;;  %777 = vtanh.f32 %v159_v32  ;;  %v202_v59 = vadd.f32 %v197_v29, %v193_v40  ;;  %v1151_v62 = vmul.f32 %v762_v38, %v1087_v56  ;;  %v169_v3 = vmul.f32 %v764_v42, %v1092_v61  ;;  %s1475_s20 = sld [smem:[#allocation2 + $0x18]] }
  0x2f   :  { %v768_v50 = vpop.eup %767  ;;  %779 = vtanh.f32 %v198_v41  ;;  %v234_v5 = vstv %s1111_s27  ;;  %v170_v9 = vmul.f32 %v766_v46, %v1092_v61  ;;  %v203_v12 = vadd.f32 %v197_v29, %v194_v48  ;;  %s1506_s21 = sld [smem:[#allocation2 + $0xc]]  ;;  %s676_s27 = sshll.u32 %s1015_s26, 4  ;;  %s677_s27 = int_to_ptr.vmem [resolvable:$true] %s676_s27 }
  0x30   :  { %v770_v55 = vpop.eup %769  ;;  %781 = vtanh.f32 %v199_v45  ;;  %v171_v10 = vmul.f32 %v768_v50, %v1092_v61  ;;  %v204_v17 = vadd.f32 %v197_v29, %v195_v52  ;;  %v205_v18 = vadd.f32 %v197_v29, %v196_v53  ;;  %s1524_s22 = sld [smem:[#allocation2 + $0x25]] }
  0x31   :  { %v772_v60 = vpop.eup %771  ;;  %783 = vtanh.f32 %v200_v49  ;;  %v172_v16 = vmul.f32 %v770_v55, %v1092_v61  ;;  %v1162_v22 = vstv %s1124_s28  ;;  %v235_v24 = vmul.f32 %v234_v5, %v1037_v0  ;;  %s1530_s23 = sld [smem:[#allocation2 + $0x19]] }
  0x32   :  { %v774_v7 = vpop.eup %773  ;;  %785 = vtanh.f32 %v201_v54  ;;  %v173_v21 = vmul.f32 %v772_v60, %v1092_v61  ;;  %v1167_v26 = vadd.f32 %v169_v3, %v1094_v63  ;;  %v236_v27 = vmul.f32 %v234_v5, %v1039_v1  ;;  %s1553_s24 = sld [smem:[#allocation2 + $0x26]] }
  0x33   :  { %v776_v14 = vpop.eup %775  ;;  %787 = vtanh.f32 %v202_v59  ;;  %v174_v25 = vmul.f32 %v774_v7, %v1092_v61  ;;  %v243_v28 = vstv %s1133_s29  ;;  %v1173_v32 = vadd.f32 %v170_v9, %v1099_v15  ;;  %s1568_s25 = sld [smem:[#allocation2 + $0x27]] }
  0x34   :  { %v778_v56 = vpop.eup %777  ;;  %v175_v30 = vmul.f32 %v776_v14, %v1092_v61  ;;  %v1176_v33 = vadd.f32 %v171_v10, %v1102_v19  ;;  %v237_v34 = vmul.f32 %v234_v5, %v1041_v2  ;;  %v1181_v63 = vadd.f32 %v172_v16, %v1104_v20 }
  0x35   :  { %v780_v29 = vpop.eup %779  ;;  %v176_v38 = vmul.f32 %v778_v56, %v1092_v61  ;;  %789 = vtanh.f32 %v203_v12  ;;  %v238_v40 = vmul.f32 %v234_v5, %v1043_v4  ;;  %v1187_v15 = vadd.f32 %v173_v21, %v1106_v23 }
  0x36   :  { %v782_v37 = vpop.eup %781  ;;  %791 = vtanh.f32 %v204_v17  ;;  %v239_v19 = vmul.f32 %v234_v5, %v1046_v6  ;;  %v244_v42 = vadd.f32 %v243_v28, %v235_v24  ;;  %v1191_v61 = vadd.f32 %v174_v25, %v1113_v31 }
  0x37   :  { %v784_v41 = vpop.eup %783  ;;  %v215_v20 = vmul.f32 %v780_v29, %v1162_v22  ;;  %v240_v46 = vmul.f32 %v234_v5, %v1049_v8  ;;  %v245_v48 = vadd.f32 %v243_v28, %v236_v27  ;;  %v1196_v50 = vadd.f32 %v175_v30, %v1116_v35 }
  0x38   :  { %v786_v45 = vpop.eup %785  ;;  %793 = vtanh.f32 %v205_v18  ;;  %v216_v23 = vmul.f32 %v782_v37, %v1162_v22  ;;  %v246_v52 = vadd.f32 %v243_v28, %v237_v34  ;;  %v1202_v53 = vadd.f32 %v176_v38, %v1118_v36 }
  0x39   :  { %v788_v49 = vpop.eup %787  ;;  %v217_v31 = vmul.f32 %v784_v41, %v1162_v22  ;;  %v241_v54 = vmul.f32 %v234_v5, %v1052_v11  ;;  %v280_v55 = vstv %s1158_s30  ;;  %v218_v59 = vmul.f32 %v786_v45, %v1162_v22  ;;  %s678_s30 = sshll.u32 %s1597_s2, 4  ;;  %s679_s30 = int_to_ptr.hbm [resolvable:$true] %s678_s30 }
  0x3a   :  { %v242_v60 = vmul.f32 %v234_v5, %v1055_v13  ;;  %v247_v35 = vadd.f32 %v243_v28, %v238_v40  ;;  %795 = vtanh.f32 %v244_v42  ;;  %v219_v7 = vmul.f32 %v788_v49, %v1162_v22 }
  0x3b   :  { %v790_v3 = vpop.eup %789  ;;  %v1211_v9 = vadd.f32 %v215_v20, %v1122_v39  ;;  %v248_v36 = vadd.f32 %v243_v28, %v239_v19  ;;  %797 = vtanh.f32 %v245_v48  ;;  %v1214_v12 = vadd.f32 %v216_v23, %v1128_v43 }
  0x3c   :  { %v792_v10 = vpop.eup %791  ;;  %v249_v14 = vadd.f32 %v243_v28, %v240_v46  ;;  %799 = vtanh.f32 %v246_v52  ;;  %v281_v16 = vmul.f32 %v280_v55, %v1037_v0  ;;  %v1220_v5 = vadd.f32 %v217_v31, %v1131_v44 }
  0x3d   :  { %v250_v17 = vadd.f32 %v243_v28, %v241_v54  ;;  %v282_v39 = vmul.f32 %v280_v55, %v1039_v1  ;;  %v289_v18 = vstv %s1184_s3  ;;  %v220_v21 = vmul.f32 %v790_v3, %v1162_v22 }
  0x3e   :  { %v794_v56 = vpop.eup %793  ;;  %v1226_v43 = vadd.f32 %v218_v59, %v1136_v47  ;;  %v251_v24 = vadd.f32 %v243_v28, %v242_v60  ;;  %801 = vtanh.f32 %v247_v35  ;;  %v221_v25 = vmul.f32 %v792_v10, %v1162_v22 }
  0x3f   :  { %v1232_v44 = vadd.f32 %v219_v7, %v1140_v51  ;;  %803 = vtanh.f32 %v248_v36  ;;  %v283_v27 = vmul.f32 %v280_v55, %v1041_v2  ;;  %v260_v30 = vstv %s1199_s4 }
  0x40   :  { %v796_v29 = vpop.eup %795  ;;  %805 = vtanh.f32 %v249_v14  ;;  %v284_v34 = vmul.f32 %v280_v55, %v1043_v4  ;;  %v290_v37 = vadd.f32 %v289_v18, %v281_v16  ;;  %v222_v28 = vmul.f32 %v794_v56, %v1162_v22 }
  0x41   :  { %v798_v47 = vpop.eup %797  ;;  %807 = vtanh.f32 %v250_v17  ;;  %v285_v38 = vmul.f32 %v280_v55, %v1046_v6  ;;  %v291_v51 = vadd.f32 %v289_v18, %v282_v39  ;;  %v286_v41 = vmul.f32 %v280_v55, %v1049_v8 }
  0x42   :  { %v800_v40 = vpop.eup %799  ;;  %809 = vtanh.f32 %v251_v24  ;;  %v287_v19 = vmul.f32 %v280_v55, %v1052_v11  ;;  %v288_v42 = vmul.f32 %v280_v55, %v1055_v13  ;;  %v1245_v45 = vadd.f32 %v220_v21, %v1145_v57 }
  0x43   :  { %v1248_v20 = vadd.f32 %v221_v25, %v1148_v58  ;;  %v261_v22 = vmul.f32 %v796_v29, %v260_v30  ;;  %v292_v46 = vadd.f32 %v289_v18, %v283_v27  ;;  %v262_v49 = vmul.f32 %v798_v47, %v260_v30 }
  0x44   :  { %v802_v48 = vpop.eup %801  ;;  %v293_v23 = vadd.f32 %v289_v18, %v284_v34  ;;  %811 = vtanh.f32 %v290_v37  ;;  %v326_v52 = vstv %s1217_s5  ;;  %v1252_v54 = vadd.f32 %v222_v28, %v1151_v62 }
  0x45   :  { %v804_v31 = vpop.eup %803  ;;  %v263_v59 = vmul.f32 %v800_v40, %v260_v30  ;;  %v294_v55 = vadd.f32 %v289_v18, %v285_v38  ;;  %813 = vtanh.f32 %v291_v51  ;;  %v295_v60 = vadd.f32 %v289_v18, %v286_v41 }
  0x46   :  { %v806_v57 = vpop.eup %805  ;;  %v296_v58 = vadd.f32 %v289_v18, %v287_v19  ;;  %v297_v35 = vadd.f32 %v289_v18, %v288_v42  ;;  %v1255_v3 = vstv %s1228_s6  ;;  %v264_v36 = vmul.f32 %v802_v48, %v260_v30 }
  0x47   :  { %v808_v7 = vpop.eup %807  ;;  %v1258_v10 = vadd.f32 %v261_v22, %v1167_v26  ;;  %815 = vtanh.f32 %v292_v46  ;;  %v327_v62 = vmul.f32 %v326_v52, %v1037_v0  ;;  %v1264_v16 = vadd.f32 %v262_v49, %v1173_v32 }
  0x48   :  { %v810_v14 = vpop.eup %809  ;;  %817 = vtanh.f32 %v293_v23  ;;  %v328_v17 = vmul.f32 %v326_v52, %v1039_v1  ;;  %v335_v39 = vstv %s1237_s7  ;;  %v265_v18 = vmul.f32 %v804_v31, %v260_v30 }
  0x49   :  { %v1271_v56 = vadd.f32 %v263_v59, %v1176_v33  ;;  %819 = vtanh.f32 %v294_v55  ;;  %v329_v26 = vmul.f32 %v326_v52, %v1041_v2  ;;  %v266_v24 = vmul.f32 %v806_v57, %v260_v30 }
  0x4a   :  { %v812_v21 = vpop.eup %811  ;;  %v267_v25 = vmul.f32 %v808_v7, %v260_v30  ;;  %821 = vtanh.f32 %v295_v60  ;;  %v330_v32 = vmul.f32 %v326_v52, %v1043_v4  ;;  %v268_v29 = vmul.f32 %v810_v14, %v260_v30 }
  0x4b   :  { %v814_v27 = vpop.eup %813  ;;  %823 = vtanh.f32 %v296_v58  ;;  %v331_v34 = vmul.f32 %v326_v52, %v1046_v6  ;;  %v336_v37 = vadd.f32 %v335_v39, %v327_v62  ;;  %v1277_v47 = vadd.f32 %v264_v36, %v1181_v63 }
  0x4c   :  { %825 = vtanh.f32 %v297_v35  ;;  %v332_v33 = vmul.f32 %v326_v52, %v1049_v8  ;;  %v337_v28 = vadd.f32 %v335_v39, %v328_v17  ;;  %v1283_v51 = vadd.f32 %v265_v18, %v1187_v15 }
  0x4d   :  { %v816_v38 = vpop.eup %815  ;;  %v307_v40 = vmul.f32 %v812_v21, %v1255_v3  ;;  %v333_v30 = vmul.f32 %v326_v52, %v1052_v11  ;;  %v338_v41 = vadd.f32 %v335_v39, %v329_v26  ;;  %v1288_v63 = vadd.f32 %v266_v24, %v1191_v61 }
  0x4e   :  { %v818_v19 = vpop.eup %817  ;;  %v1291_v42 = vadd.f32 %v267_v25, %v1196_v50  ;;  %v308_v22 = vmul.f32 %v814_v27, %v1255_v3  ;;  %v339_v46 = vadd.f32 %v335_v39, %v330_v32  ;;  %v1295_v15 = vadd.f32 %v268_v29, %v1202_v53 }
  0x4f   :  { %v820_v48 = vpop.eup %819  ;;  %v334_v49 = vmul.f32 %v326_v52, %v1055_v13  ;;  %v340_v23 = vadd.f32 %v335_v39, %v331_v34  ;;  %827 = vtanh.f32 %v336_v37  ;;  %v341_v59 = vadd.f32 %v335_v39, %v332_v33 }
  0x50   :  { %v822_v31 = vpop.eup %821  ;;  %829 = vtanh.f32 %v337_v28  ;;  %v1299_v55 = vstv %s1260_s8  ;;  %v372_v61 = vstv %s1268_s9  ;;  %v309_v50 = vmul.f32 %v816_v38, %v1255_v3 }
  0x51   :  { %v824_v57 = vpop.eup %823  ;;  %v1304_v60 = vadd.f32 %v307_v40, %v1211_v9  ;;  %v342_v58 = vadd.f32 %v335_v39, %v333_v30  ;;  %831 = vtanh.f32 %v338_v41  ;;  %v310_v52 = vmul.f32 %v818_v19, %v1255_v3 }
  0x52   :  { %v826_v53 = vpop.eup %825  ;;  %v311_v35 = vmul.f32 %v820_v48, %v1255_v3  ;;  %v1309_v7 = vadd.f32 %v308_v22, %v1214_v12  ;;  %833 = vtanh.f32 %v339_v46  ;;  %v312_v36 = vmul.f32 %v822_v31, %v1255_v3 }
  0x53   :  { %v343_v62 = vadd.f32 %v335_v39, %v334_v49  ;;  %835 = vtanh.f32 %v340_v23  ;;  %v373_v9 = vmul.f32 %v372_v61, %v1037_v0  ;;  %v313_v14 = vmul.f32 %v824_v57, %v1255_v3 }
  0x54   :  { %837 = vtanh.f32 %v341_v59  ;;  %v374_v17 = vmul.f32 %v372_v61, %v1039_v1  ;;  %v381_v18 = vstv %s1280_s10  ;;  %v314_v12 = vmul.f32 %v826_v53, %v1255_v3 }
  0x55   :  { %v828_v26 = vpop.eup %827  ;;  %839 = vtanh.f32 %v342_v58  ;;  %v375_v21 = vmul.f32 %v372_v61, %v1041_v2  ;;  %v376_v24 = vmul.f32 %v372_v61, %v1043_v4  ;;  %v1324_v25 = vadd.f32 %v309_v50, %v1220_v5 }
  0x56   :  { %v830_v39 = vpop.eup %829  ;;  %v1327_v32 = vadd.f32 %v310_v52, %v1226_v43  ;;  %v377_v27 = vmul.f32 %v372_v61, %v1046_v6  ;;  %v378_v29 = vmul.f32 %v372_v61, %v1049_v8  ;;  %v1334_v3 = vadd.f32 %v311_v35, %v1232_v44 }
  0x57   :  { %v832_v34 = vpop.eup %831  ;;  %841 = vtanh.f32 %v343_v62  ;;  %v379_v37 = vmul.f32 %v372_v61, %v1052_v11  ;;  %v382_v33 = vadd.f32 %v381_v18, %v373_v9  ;;  %v1338_v28 = vadd.f32 %v312_v36, %v1245_v45 }
  0x58   :  { %v834_v5 = vpop.eup %833  ;;  %v1341_v43 = vadd.f32 %v313_v14, %v1248_v20  ;;  %v380_v38 = vmul.f32 %v372_v61, %v1055_v13  ;;  %v383_v40 = vadd.f32 %v381_v18, %v374_v17  ;;  %v1345_v41 = vadd.f32 %v314_v12, %v1252_v54 }
  0x59   :  { %v836_v30 = vpop.eup %835  ;;  %v353_v44 = vmul.f32 %v828_v26, %v1299_v55  ;;  %v384_v19 = vadd.f32 %v381_v18, %v375_v21  ;;  %v385_v22 = vadd.f32 %v381_v18, %v376_v24  ;;  %v354_v48 = vmul.f32 %v830_v39, %v1299_v55 }
  0x5a   :  { %v838_v46 = vpop.eup %837  ;;  %v386_v45 = vadd.f32 %v381_v18, %v377_v27  ;;  %v387_v49 = vadd.f32 %v381_v18, %v378_v29  ;;  %v418_v23 = vstv %s1311_s11  ;;  %v355_v31 = vmul.f32 %v832_v34, %v1299_v55 }
  0x5b   :  { %v840_v20 = vpop.eup %839  ;;  %v356_v59 = vmul.f32 %v834_v5, %v1299_v55  ;;  %v388_v61 = vadd.f32 %v381_v18, %v379_v37  ;;  %843 = vtanh.f32 %v382_v33  ;;  %v357_v54 = vmul.f32 %v836_v30, %v1299_v55 }
  0x5c   :  { %v389_v57 = vadd.f32 %v381_v18, %v380_v38  ;;  %845 = vtanh.f32 %v383_v40  ;;  %v1356_v50 = vstv %s1316_s12  ;;  %v358_v53 = vmul.f32 %v838_v46, %v1299_v55 }
  0x5d   :  { %v842_v58 = vpop.eup %841  ;;  %v1360_v52 = vadd.f32 %v353_v44, %v1258_v10  ;;  %847 = vtanh.f32 %v384_v19  ;;  %v419_v35 = vmul.f32 %v418_v23, %v1037_v0  ;;  %v359_v36 = vmul.f32 %v840_v20, %v1299_v55 }
  0x5e   :  { %v1365_v62 = vadd.f32 %v354_v48, %v1264_v16  ;;  %v420_v9 = vmul.f32 %v418_v23, %v1039_v1  ;;  %v427_v14 = vstv %s1331_s13  ;;  %v1370_v17 = vadd.f32 %v355_v31, %v1271_v56 }
  0x5f   :  { %v1373_v18 = vadd.f32 %v356_v59, %v1277_v47  ;;  %849 = vtanh.f32 %v385_v22  ;;  %v421_v10 = vmul.f32 %v418_v23, %v1041_v2  ;;  %v360_v26 = vmul.f32 %v842_v58, %v1299_v55 }
  0x60   :  { %v1380_v12 = vadd.f32 %v357_v54, %v1283_v51  ;;  %851 = vtanh.f32 %v386_v45  ;;  %v422_v16 = vmul.f32 %v418_v23, %v1043_v4  ;;  %v1384_v56 = vadd.f32 %v358_v53, %v1288_v63 }
  0x61   :  { %v844_v21 = vpop.eup %843  ;;  %853 = vtanh.f32 %v387_v49  ;;  %v423_v47 = vmul.f32 %v418_v23, %v1046_v6  ;;  %v428_v24 = vadd.f32 %v427_v14, %v419_v35  ;;  %v1388_v27 = vadd.f32 %v359_v36, %v1291_v42 }
  0x62   :  { %v846_v39 = vpop.eup %845  ;;  %855 = vtanh.f32 %v388_v61  ;;  %v424_v51 = vmul.f32 %v418_v23, %v1049_v8  ;;  %v429_v55 = vadd.f32 %v427_v14, %v420_v9  ;;  %v425_v34 = vmul.f32 %v418_v23, %v1052_v11 }
  0x63   :  { %v848_v29 = vpop.eup %847  ;;  %857 = vtanh.f32 %v389_v57  ;;  %v430_v37 = vadd.f32 %v427_v14, %v421_v10  ;;  %v464_v33 = vstv %s1352_s14  ;;  %v1394_v63 = vadd.f32 %v360_v26, %v1295_v15 }
  0x64   :  { %v399_v5 = vmul.f32 %v844_v21, %v1356_v50  ;;  %v426_v42 = vmul.f32 %v418_v23, %v1055_v13  ;;  %v431_v38 = vadd.f32 %v427_v14, %v422_v16  ;;  %v400_v30 = vmul.f32 %v846_v39, %v1356_v50 }
  0x65   :  { %v850_v40 = vpop.eup %849  ;;  %v432_v44 = vadd.f32 %v427_v14, %v423_v47  ;;  %859 = vtanh.f32 %v428_v24  ;;  %v465_v19 = vmul.f32 %v464_v33, %v1037_v0  ;;  %v401_v46 = vmul.f32 %v848_v29, %v1356_v50 }
  0x66   :  { %v852_v22 = vpop.eup %851  ;;  %v433_v15 = vadd.f32 %v427_v14, %v424_v51  ;;  %861 = vtanh.f32 %v429_v55  ;;  %v466_v48 = vmul.f32 %v464_v33, %v1039_v1  ;;  %v434_v49 = vadd.f32 %v427_v14, %v425_v34 }
  0x67   :  { %v854_v45 = vpop.eup %853  ;;  %863 = vtanh.f32 %v430_v37  ;;  %v467_v23 = vmul.f32 %v464_v33, %v1041_v2  ;;  %v473_v20 = vstv %s1376_s15  ;;  %v1407_v59 = vadd.f32 %v399_v5, %v1304_v60 }
  0x68   :  { %v856_v31 = vpop.eup %855  ;;  %v435_v61 = vadd.f32 %v427_v14, %v426_v42  ;;  %865 = vtanh.f32 %v431_v38  ;;  %v468_v54 = vmul.f32 %v464_v33, %v1043_v4  ;;  %v402_v58 = vmul.f32 %v850_v40, %v1356_v50 }
  0x69   :  { %v858_v57 = vpop.eup %857  ;;  %v1412_v53 = vadd.f32 %v400_v30, %v1309_v7  ;;  %867 = vtanh.f32 %v432_v44  ;;  %v474_v35 = vadd.f32 %v473_v20, %v465_v19  ;;  %v403_v36 = vmul.f32 %v852_v22, %v1356_v50 }
  0x6a   :  { %v1418_v60 = vadd.f32 %v401_v46, %v1324_v25  ;;  %869 = vtanh.f32 %v433_v15  ;;  %v475_v9 = vadd.f32 %v473_v20, %v466_v48  ;;  %v404_v10 = vmul.f32 %v854_v45, %v1356_v50 }
  0x6b   :  { %v860_v14 = vpop.eup %859  ;;  %871 = vtanh.f32 %v434_v49  ;;  %v469_v7 = vmul.f32 %v464_v33, %v1046_v6  ;;  %v476_v26 = vadd.f32 %v473_v20, %v467_v23  ;;  %v444_v21 = vstv %s1397_s16 }
  0x6c   :  { %v862_v16 = vpop.eup %861  ;;  %873 = vtanh.f32 %v435_v61  ;;  %v470_v47 = vmul.f32 %v464_v33, %v1049_v8  ;;  %v477_v24 = vadd.f32 %v473_v20, %v468_v54  ;;  %v405_v25 = vmul.f32 %v856_v31, %v1356_v50 }
  0x6d   :  { %v864_v39 = vpop.eup %863  ;;  %v406_v51 = vmul.f32 %v858_v57, %v1356_v50  ;;  %v1429_v55 = vadd.f32 %v402_v58, %v1327_v32  ;;  %875 = vtanh.f32 %v474_v35  ;;  %v1432_v34 = vadd.f32 %v403_v36, %v1334_v3 }
  0x6e   :  { %v866_v29 = vpop.eup %865  ;;  %v471_v6 = vmul.f32 %v464_v33, %v1052_v11  ;;  %v472_v37 = vmul.f32 %v464_v33, %v1055_v13  ;;  %877 = vtanh.f32 %v475_v9  ;;  %v445_v5 = vmul.f32 %v860_v14, %v444_v21  ;;  %v1486_v9 = vld [vmem:[#allocation6 + $0x20] sm:$0xff]  ;;  %v1489_v14 = vld [vmem:[#allocation6 + $0x28] sm:$0xff] }
  0x6f   :  { %v868_v8 = vpop.eup %867  ;;  %v446_v42 = vmul.f32 %v862_v16, %v444_v21  ;;  %v478_v50 = vadd.f32 %v473_v20, %v469_v7  ;;  %879 = vtanh.f32 %v476_v26  ;;  %v1439_v38 = vadd.f32 %v404_v10, %v1338_v28 }
  0x70   :  { %v870_v32 = vpop.eup %869  ;;  %v447_v3 = vmul.f32 %v864_v39, %v444_v21  ;;  %v479_v40 = vadd.f32 %v473_v20, %v470_v47  ;;  %881 = vtanh.f32 %v477_v24  ;;  %v1442_v13 = vadd.f32 %v405_v25, %v1341_v43  ;;  %v1499_v24 = vld [vmem:[#allocation6 + $0x38] sm:$0xff] }
  0x71   :  { %v872_v11 = vpop.eup %871  ;;  %v1445_v33 = vadd.f32 %v406_v51, %v1345_v41  ;;  %v448_v30 = vmul.f32 %v866_v29, %v444_v21  ;;  %v510_v44 = vstv %s1414_s17  ;;  %v449_v22 = vmul.f32 %v868_v8, %v444_v21 }
  0x72   :  { %v874_v19 = vpop.eup %873  ;;  %v480_v46 = vadd.f32 %v473_v20, %v471_v6  ;;  %v481_v15 = vadd.f32 %v473_v20, %v472_v37  ;;  %v1451_v28 = vstv %s1420_s18  ;;  %v450_v45 = vmul.f32 %v870_v32, %v444_v21 }
  0x73   :  { %v876_v48 = vpop.eup %875  ;;  %v1456_v43 = vadd.f32 %v445_v5, %v1360_v52  ;;  %v1459_v41 = vadd.f32 %v446_v42, %v1365_v62  ;;  %883 = vtanh.f32 %v478_v50  ;;  %v451_v23 = vmul.f32 %v872_v11, %v444_v21 }
  0x74   :  { %v878_v49 = vpop.eup %877  ;;  %v1462_v31 = vadd.f32 %v447_v3, %v1370_v17  ;;  %885 = vtanh.f32 %v479_v40  ;;  %v511_v20 = vmul.f32 %v510_v44, %v1037_v0  ;;  %v452_v54 = vmul.f32 %v874_v19, %v444_v21  ;;  %v944_v19 = vld [vmem:[#allocation6 + $0x8] sm:$0xff] }
  0x75   :  { %v880_v61 = vpop.eup %879  ;;  %v1466_v57 = vadd.f32 %v448_v30, %v1373_v18  ;;  %v512_v52 = vmul.f32 %v510_v44, %v1039_v1  ;;  %v513_v62 = vmul.f32 %v510_v44, %v1041_v2  ;;  %v1471_v35 = vadd.f32 %v449_v22, %v1380_v12 }
  0x76   :  { %v882_v58 = vpop.eup %881  ;;  %887 = vtanh.f32 %v480_v46  ;;  %v514_v17 = vmul.f32 %v510_v44, %v1043_v4  ;;  %v519_v36 = vstv %s1436_s19  ;;  %v1478_v0 = vadd.f32 %v450_v45, %v1384_v56 }
  0x77   :  { %889 = vtanh.f32 %v481_v15  ;;  %v491_v18 = vmul.f32 %v876_v48, %v1451_v28  ;;  %v492_v1 = vmul.f32 %v878_v49, %v1451_v28  ;;  %v1483_v2 = vadd.f32 %v451_v23, %v1388_v27  ;;  %v1496_v27 = vld [vmem:[#allocation6 + $0x30] sm:$0xff]  ;;  %v946_v23 = vld [vmem:[#allocation6 + $0x18] sm:$0xff] }
  0x78   :  { %v493_v12 = vmul.f32 %v880_v61, %v1451_v28  ;;  %v515_v4 = vmul.f32 %v1486_v9, %v510_v44  ;;  %v516_v56 = vmul.f32 %v1489_v14, %v510_v44  ;;  %v1493_v7 = vadd.f32 %v452_v54, %v1394_v63  ;;  %v945_v48 = vld [vmem:[#allocation6 + $0x10] sm:$0xff] }
  0x79   :  { %v884_v10 = vpop.eup %883  ;;  %v494_v26 = vmul.f32 %v882_v58, %v1451_v28  ;;  %v517_v16 = vmul.f32 %v1496_v27, %v510_v44  ;;  %v520_v21 = vadd.f32 %v519_v36, %v511_v20  ;;  %v518_v39 = vmul.f32 %v1499_v24, %v510_v44 }
  0x7a   :  { %v886_v47 = vpop.eup %885  ;;  %v521_v25 = vadd.f32 %v519_v36, %v512_v52  ;;  %v1503_v51 = vstv %s1447_s0  ;;  %v556_v29 = vstv %s1453_s1  ;;  %v1509_v63 = vadd.f32 %v491_v18, %v1407_v59 }
  0x7b   :  { %v1512_v6 = vadd.f32 %v492_v1, %v1412_v53  ;;  %v522_v37 = vadd.f32 %v519_v36, %v513_v62  ;;  %v523_v8 = vadd.f32 %v519_v36, %v514_v17  ;;  %v495_v42 = vmul.f32 %v884_v10, %v1451_v28  ;;  %v943_v53 = vld [vmem:[#allocation6] sm:$0xff] }
  0x7c   :  { %v888_v5 = vpop.eup %887  ;;  %v1516_v50 = vadd.f32 %v493_v12, %v1418_v60  ;;  %v524_v32 = vadd.f32 %v519_v36, %v515_v4  ;;  %v525_v3 = vadd.f32 %v519_v36, %v516_v56  ;;  %v496_v11 = vmul.f32 %v886_v47, %v1451_v28 }
  0x7d   :  { %v890_v40 = vpop.eup %889  ;;  %v1520_v59 = vadd.f32 %v494_v26, %v1429_v55  ;;  %891 = vtanh.f32 %v520_v21  ;;  %v557_v30 = vmul.f32 %v943_v53, %v556_v29  ;;  %v526_v44 = vadd.f32 %v519_v36, %v517_v16 }
  0x7e   :  { %893 = vtanh.f32 %v521_v25  ;;  %v558_v22 = vmul.f32 %v944_v19, %v556_v29  ;;  %v565_v46 = vstv %s1475_s20  ;;  %v497_v15 = vmul.f32 %v888_v5, %v1451_v28 }
  0x7f   :  { %v527_v60 = vadd.f32 %v519_v36, %v518_v39  ;;  %895 = vtanh.f32 %v522_v37  ;;  %v559_v45 = vmul.f32 %v945_v48, %v556_v29  ;;  %v498_v55 = vmul.f32 %v890_v40, %v1451_v28 }
  0x80   :  { %v1528_v49 = vadd.f32 %v495_v42, %v1432_v34  ;;  %897 = vtanh.f32 %v523_v8  ;;  %v560_v20 = vmul.f32 %v946_v23, %v556_v29  ;;  %v561_v61 = vmul.f32 %v1486_v9, %v556_v29 }
  0x81   :  { %899 = vtanh.f32 %v524_v32  ;;  %v562_v54 = vmul.f32 %v1489_v14, %v556_v29  ;;  %v566_v52 = vadd.f32 %v565_v46, %v557_v30  ;;  %v563_v62 = vmul.f32 %v1496_v27, %v556_v29 }
  0x82   :  { %901 = vtanh.f32 %v525_v3  ;;  %v567_v58 = vadd.f32 %v565_v46, %v558_v22  ;;  %v602_v17 = vstv %s1506_s21  ;;  %v1537_v34 = vadd.f32 %v496_v11, %v1439_v38 }
  0x83   :  { %v892_v28 = vpop.eup %891  ;;  %903 = vtanh.f32 %v526_v44  ;;  %v564_v36 = vmul.f32 %v1499_v24, %v556_v29  ;;  %v568_v18 = vadd.f32 %v565_v46, %v559_v45  ;;  %v1541_v12 = vadd.f32 %v497_v15, %v1442_v13 }
  0x84   :  { %v894_v1 = vpop.eup %893  ;;  %v1544_v4 = vadd.f32 %v498_v55, %v1445_v33  ;;  %905 = vtanh.f32 %v527_v60  ;;  %v569_v56 = vadd.f32 %v565_v46, %v560_v20  ;;  %v570_v26 = vadd.f32 %v565_v46, %v561_v61 }
  0x85   :  { %v896_v10 = vpop.eup %895  ;;  %v571_v16 = vadd.f32 %v565_v46, %v562_v54  ;;  %907 = vtanh.f32 %v566_v52  ;;  %v603_v38 = vmul.f32 %v943_v53, %v602_v17  ;;  %v537_v47 = vmul.f32 %v892_v28, %v1503_v51 }
  0x86   :  { %v898_v21 = vpop.eup %897  ;;  %v572_v39 = vadd.f32 %v565_v46, %v563_v62  ;;  %909 = vtanh.f32 %v567_v58  ;;  %v604_v25 = vmul.f32 %v944_v19, %v602_v17  ;;  %v538_v29 = vmul.f32 %v894_v1, %v1503_v51 }
  0x87   :  { %v900_v13 = vpop.eup %899  ;;  %v573_v33 = vadd.f32 %v565_v46, %v564_v36  ;;  %911 = vtanh.f32 %v568_v18  ;;  %v605_v37 = vmul.f32 %v945_v48, %v602_v17  ;;  %v1549_v5 = vstv %s1524_s22 }
  0x88   :  { %v902_v8 = vpop.eup %901  ;;  %913 = vtanh.f32 %v569_v56  ;;  %v606_v42 = vmul.f32 %v946_v23, %v602_v17  ;;  %v611_v32 = vstv %s1530_s23  ;;  %v539_v40 = vmul.f32 %v896_v10, %v1503_v51 }
  0x89   :  { %v904_v3 = vpop.eup %903  ;;  %915 = vtanh.f32 %v570_v26  ;;  %v607_v11 = vmul.f32 %v1486_v9, %v602_v17  ;;  %v612_v53 = vadd.f32 %v611_v32, %v603_v38  ;;  %v540_v44 = vmul.f32 %v898_v21, %v1503_v51 }
  0x8a   :  { %v906_v30 = vpop.eup %905  ;;  %917 = vtanh.f32 %v571_v16  ;;  %v608_v19 = vmul.f32 %v1489_v14, %v602_v17  ;;  %v613_v22 = vadd.f32 %v611_v32, %v604_v25  ;;  %v545_v15 = vadd.f32 %v537_v47, %v1456_v43 }
  0x8b   :  { %v908_v46 = vpop.eup %907  ;;  %919 = vtanh.f32 %v572_v39  ;;  %v609_v60 = vmul.f32 %v1496_v27, %v602_v17  ;;  %v614_v48 = vadd.f32 %v611_v32, %v605_v37  ;;  %v541_v55 = vmul.f32 %v900_v13, %v1503_v51 }
  0x8c   :  { %v910_v45 = vpop.eup %909  ;;  %921 = vtanh.f32 %v573_v33  ;;  %v610_v9 = vmul.f32 %v1499_v24, %v602_v17  ;;  %v615_v23 = vadd.f32 %v611_v32, %v606_v42  ;;  %v546_v61 = vadd.f32 %v538_v29, %v1459_v41 }
  0x8d   :  { %v912_v20 = vpop.eup %911  ;;  %v547_v14 = vadd.f32 %v539_v40, %v1462_v31  ;;  %v616_v54 = vadd.f32 %v611_v32, %v607_v11  ;;  %923 = vtanh.f32 %v612_v53  ;;  %v542_v43 = vmul.f32 %v902_v8, %v1503_v51 }
  0x8e   :  { %v914_v52 = vpop.eup %913  ;;  %v548_v27 = vadd.f32 %v540_v44, %v1466_v57  ;;  %v617_v62 = vadd.f32 %v611_v32, %v608_v19  ;;  %925 = vtanh.f32 %v613_v22  ;;  %v543_v28 = vmul.f32 %v904_v3, %v1503_v51 }
  0x8f   :  { %v916_v58 = vpop.eup %915  ;;  %v544_v24 = vmul.f32 %v906_v30, %v1503_v51  ;;  %v618_v17 = vadd.f32 %v611_v32, %v609_v60  ;;  %927 = vtanh.f32 %v614_v48  ;;  %v549_v31 = vadd.f32 %v541_v55, %v1471_v35 }
  0x90   :  { %v918_v41 = vpop.eup %917  ;;  %v583_v36 = vmul.f32 %v908_v46, %v1549_v5  ;;  %v619_v18 = vadd.f32 %v611_v32, %v610_v9  ;;  %929 = vtanh.f32 %v615_v23  ;;  %v584_v1 = vmul.f32 %v910_v45, %v1549_v5 }
  0x91   :  { %v920_v57 = vpop.eup %919  ;;  %v585_v56 = vmul.f32 %v912_v20, %v1549_v5  ;;  %931 = vtanh.f32 %v616_v54  ;;  %v628_v10 = vstv %s1553_s24  ;;  %v550_v51 = vadd.f32 %v542_v43, %v1478_v0 }
  0x92   :  { %v922_v26 = vpop.eup %921  ;;  %v586_v16 = vmul.f32 %v914_v52, %v1549_v5  ;;  %v587_v38 = vmul.f32 %v916_v58, %v1549_v5  ;;  %933 = vtanh.f32 %v617_v62  ;;  %v551_v21 = vadd.f32 %v543_v28, %v1483_v2 }
  0x93   :  { %v924_v35 = vpop.eup %923  ;;  %v552_v47 = vadd.f32 %v544_v24, %v1493_v7  ;;  %v588_v39 = vmul.f32 %v918_v41, %v1549_v5  ;;  %935 = vtanh.f32 %v618_v17  ;;  %v589_v13 = vmul.f32 %v920_v57, %v1549_v5 }
  0x94   :  { %v926_v25 = vpop.eup %925  ;;  %v591_v29 = vadd.f32 %v583_v36, %v1509_v63  ;;  %937 = vtanh.f32 %v619_v18  ;;  %v629_v0 = vmul.f32 %v924_v35, %v628_v10  ;;  %v590_v37 = vmul.f32 %v922_v26, %v1549_v5 }
  0x95   :  { %v928_v33 = vpop.eup %927  ;;  %v592_v8 = vadd.f32 %v584_v1, %v1512_v6  ;;  %v593_v2 = vadd.f32 %v585_v56, %v1516_v50  ;;  %v630_v42 = vmul.f32 %v926_v25, %v628_v10  ;;  %v594_v32 = vadd.f32 %v586_v16, %v1520_v59 }
  0x96   :  { %v930_v7 = vpop.eup %929  ;;  %v595_v3 = vadd.f32 %v587_v38, %v1528_v49  ;;  %v631_v40 = vmul.f32 %v928_v33, %v628_v10  ;;  %v637_v11 = vadd.f32 %v629_v0, %v545_v15  ;;  %v596_v63 = vadd.f32 %v588_v39, %v1537_v34 }
  0x97   :  { %v932_v53 = vpop.eup %931  ;;  %v632_v30 = vmul.f32 %v930_v7, %v628_v10  ;;  %v638_v44 = vadd.f32 %v630_v42, %v546_v61  ;;  %v654_v19 = vstv %s1568_s25  ;;  %v597_v5 = vadd.f32 %v589_v13, %v1541_v12 }
  0x98   :  { %v934_v22 = vpop.eup %933  ;;  %v633_v6 = vmul.f32 %v932_v53, %v628_v10  ;;  %v639_v46 = vadd.f32 %v631_v40, %v547_v14  ;;  %v645_v50 = vadd.f32 %v637_v11, %v591_v29  ;;  %v598_v48 = vadd.f32 %v590_v37, %v1544_v4 }
  0x99   :  { %v936_v60 = vpop.eup %935  ;;  %v634_v59 = vmul.f32 %v934_v22, %v628_v10  ;;  %v640_v45 = vadd.f32 %v632_v30, %v548_v27  ;;  %v646_v49 = vadd.f32 %v638_v44, %v592_v8 }
  0x9a   :  { %v938_v55 = vpop.eup %937  ;;  %v635_v15 = vmul.f32 %v936_v60, %v628_v10  ;;  %v641_v9 = vadd.f32 %v633_v6, %v549_v31  ;;  %v647_v23 = vadd.f32 %v639_v46, %v593_v2  ;;  %v655_v34 = vadd.f32 %v654_v19, %v645_v50 }
  0x9b   :  { %v636_v20 = vmul.f32 %v938_v55, %v628_v10  ;;  %v642_v61 = vadd.f32 %v634_v59, %v550_v51  ;;  %v648_v54 = vadd.f32 %v640_v45, %v594_v32  ;;  %v656_v52 = vadd.f32 %v654_v19, %v646_v49 }
  0x9c   :  { %v643_v43 = vadd.f32 %v635_v15, %v551_v21  ;;  %v649_v12 = vadd.f32 %v641_v9, %v595_v3  ;;  %v657_v62 = vadd.f32 %v654_v19, %v647_v23  ;;  %663 = vst [vmem:[#allocation7] sm:$0xff] %v655_v34 }
  0x9d   :  { %v644_v14 = vadd.f32 %v636_v20, %v552_v47  ;;  %v650_v58 = vadd.f32 %v642_v61, %v596_v63  ;;  %v658_v28 = vadd.f32 %v654_v19, %v648_v54  ;;  %664 = vst [vmem:[#allocation7 + $0x8] sm:$0xff] %v656_v52 }
  0x9e   :  { %v651_v4 = vadd.f32 %v643_v43, %v597_v5  ;;  %v659_v27 = vadd.f32 %v654_v19, %v649_v12  ;;  %665 = vst [vmem:[#allocation7 + $0x10] sm:$0xff] %v657_v62 }
  0x9f   :  { %v652_v24 = vadd.f32 %v644_v14, %v598_v48  ;;  %v660_v17 = vadd.f32 %v654_v19, %v650_v58  ;;  %666 = vst [vmem:[#allocation7 + $0x18] sm:$0xff] %v658_v28 }
  0xa0   :  { %v661_v41 = vadd.f32 %v654_v19, %v651_v4  ;;  %667 = vst [vmem:[#allocation7 + $0x20] sm:$0xff] %v659_v27 }
  0xa1   :  { %v662_v31 = vadd.f32 %v654_v19, %v652_v24  ;;  %668 = vst [vmem:[#allocation7 + $0x28] sm:$0xff] %v660_v17 }
  0xa2   :  { %669 = vst [vmem:[#allocation7 + $0x30] sm:$0xff] %v661_v41 }
  0xa3   :  { %670 = vst [vmem:[#allocation7 + $0x38] sm:$0xff] %v662_v31 }
  0xa4   :  { %681 = dma.vmem_to_hbm [thread:$0]  %s677_s27, 1024, %s679_s30, [#allocation4]  }
  0xa5   :  { %1011 = dma.done.wait [#allocation4], 1024  }
  0xa6   :  { %1012 = vsyncadd [#allocation4], 4294966272 }
  0xa7   :  { %686 = vsyncpa [#allocation3], 1 }
  0xa8   :  { %687 = vsyncpa [#allocation4], 1 }
  0xa9   :  { %688 = vsyncpa [#allocation5], 1 }

</bundles_post_ra>
